<compile_context>
chip_gen: v6e
topology: v6e:2x2x1
jax: 0.10.0
libtpu: 0.0.40
codegen_flags: <defaults>
</compile_context>

<pallas_src>
import functools

import numpy as np
import jax
import jax.numpy as jnp
from jax import lax
from jax.experimental import pallas as pl
from jax.experimental.pallas import tpu as pltpu

_LANE = 128


# ------------------------------ kernel --------------------------------------
def _postprocess_kernel(logits_t_ref, toklab_ref, scores_ref, labels_ref, *,
                        chunk_size):
    # logits_t_ref: (1, T, TILE_N) selected raw logits (tokens on sublanes,
    #                              selected queries on lanes)
    # toklab_ref:   (T, 1)         float32; min 0-based label owning token t,
    #                              or chunk_size if the token is unowned
    # scores_ref:   (1, 1, TILE_N) sqrt of per-query best OD score (lane-dense)
    # labels_ref:   (1, 1, TILE_N) 1-based label of that score (lane-dense)
    x = logits_t_ref[0]                                   # [T, N] raw logits
    # Hoisted lane broadcast of the token-label column, reused twice below.
    tl = jnp.broadcast_to(toklab_ref[...], x.shape)       # [T, N]
    owned = tl < float(chunk_size)                        # [T, N]

    # convert_grounding_to_od_logits(score_agg='MAX') + max/argmax over labels,
    # done entirely in logit space (sigmoid is strictly monotone): the global
    # max over owned tokens equals max_c(max over label-c tokens); the argmax
    # label equals the min owning label over the maximizing tokens (min of mins
    # == min of the union), matching torch argmax's first-index tie-break.
    neg = jnp.finfo(x.dtype).min
    masked = jnp.where(owned, x, neg)                     # [T, N] logit space
    xmax = jnp.max(masked, axis=0, keepdims=True)         # [1, N]
    cand = jnp.where(masked >= xmax, tl, float(chunk_size))     # [T, N]
    lab = jnp.min(cand, axis=0, keepdims=True).astype(jnp.int32)  # [1, N]
    # empty positive_map -> xmax == finfo.min and lab == chunk_size; torch
    # (argmax over an all-zero score row) gives label index 0.
    lab = jnp.where(lab >= chunk_size, 0, lab)

    # EUP work only on the [1, N] row (sigmoid + sqrt), not the full tile.
    xmax32 = xmax.astype(jnp.float32)
    scores_ref[0] = jnp.sqrt(jax.nn.sigmoid(xmax32))      # BoxList 'scores'
    labels_ref[0] = lab + 1                               # BoxList 'labels'


def postprocess_selected(sel_logits_t, token_label, chunk_size):
    B, T, N = sel_logits_t.shape
    tile_n = min(_LANE, N)
    assert N % tile_n == 0, "pad N to a multiple of 128 in the wrapper"
    grid = (B, N // tile_n)
    kernel = functools.partial(_postprocess_kernel, chunk_size=chunk_size)
    return pl.pallas_call(
        kernel,
        out_shape=(
            jax.ShapeDtypeStruct((B, 1, N), jnp.float32),   # sqrt(scores)
            jax.ShapeDtypeStruct((B, 1, N), jnp.int32),     # labels + 1
        ),
        grid_spec=pltpu.PrefetchScalarGridSpec(
            num_scalar_prefetch=0,
            grid=grid,
            in_specs=[
                pl.BlockSpec((1, T, tile_n), lambda b, n: (b, 0, n)),
                pl.BlockSpec((T, 1), lambda b, n: (0, 0)),
            ],
            out_specs=(
                pl.BlockSpec((1, 1, tile_n), lambda b, n: (b, 0, n)),
                pl.BlockSpec((1, 1, tile_n), lambda b, n: (b, 0, n)),
            ),
        ),
        compiler_params=pltpu.CompilerParams(
            dimension_semantics=("parallel", "parallel")),
    )(sel_logits_t, token_label)


# ------------------------------ wrapper -------------------------------------
def build_token_labels(positive_map, chunk_size, num_tokens):
    """token_label[t] = min 0-based label owning token t, else chunk_size."""
    tl = np.full((num_tokens, 1), float(chunk_size), dtype=np.float32)
    for label_j, toks in positive_map.items():
        assert 1 <= label_j <= chunk_size, (
            f"positive_map label {label_j} exceeds chunk_size {chunk_size}")
        c = float(label_j - 1)
        for t in np.asarray(toks, dtype=np.int64):
            assert 0 <= t < num_tokens, f"token index {t} out of range"
            tl[t, 0] = min(tl[t, 0], c)
    return jnp.asarray(tl)


def post_process(pred_logits, pred_boxes, positive_map, target_sizes,
                 num_select=300, chunk_size=80):
    B, Q, T = pred_logits.shape
    # sigmoid is monotone: top-k over raw per-query max logits selects the same
    # queries as top-k over max sigmoid; the max fuses into XLA's top_k input.
    qmax = jnp.max(pred_logits, axis=-1)                          # [B, Q]
    _, topk_idx = lax.top_k(qmax, num_select)                     # [B, N]

    # Pad the selected-query axis to a multiple of 128 lanes by padding the
    # index list (duplicates of query 0; results sliced off after the kernel),
    # so the gather below already emits the lane-dense padded slab.
    n_pad = ((num_select + _LANE - 1) // _LANE) * _LANE
    if n_pad != num_select:
        pad = jnp.zeros((B, n_pad - num_select), dtype=topk_idx.dtype)
        topk_idx_p = jnp.concatenate([topk_idx, pad], axis=1)     # [B, N_pad]
    else:
        topk_idx_p = topk_idx

    # Gather directly into (B, T, N_pad): output[b, t, n] =
    # pred_logits[b, topk_idx_p[b, n], t] -- the transpose is fused into the
    # gather, no separate copy of the selected slab.
    batch_ix = jnp.broadcast_to(
        jnp.arange(B, dtype=topk_idx_p.dtype)[:, None], topk_idx_p.shape)
    start = jnp.stack([batch_ix, topk_idx_p], axis=-1)            # [B, N_pad, 2]
    dnums = lax.GatherDimensionNumbers(
        offset_dims=(1,), collapsed_slice_dims=(0, 1), start_index_map=(0, 1))
    sel_logits_t = lax.gather(pred_logits, start, dnums,
                              slice_sizes=(1, 1, T))              # [B, T, N_pad]

    sel_boxes = jnp.take_along_axis(pred_boxes, topk_idx[:, :, None], axis=1)

    token_label = build_token_labels(positive_map, chunk_size, T)  # [T, 1]

    scores_p, labels_p = postprocess_selected(sel_logits_t, token_label,
                                              chunk_size)
    scores = scores_p[:, 0, :num_select]                           # [B, N]
    labels = labels_p[:, 0, :num_select]                           # [B, N]

    # Box scaling by [W, H, W, H] stays in XLA (fused elementwise multiply).
    tgsz = jnp.asarray(target_sizes, dtype=jnp.float32)            # [B, 2] (H,W)
    scale_fct = jnp.tile(tgsz[:, ::-1], (1, 2))                    # [B, 4]
    boxes = sel_boxes * scale_fct[:, None, :]                      # [B, N, 4]

    # test=False path: no cxcywh -> xyxy conversion.
    # TODO(synk): BoxList construction / clip_to_image(remove_empty=False) is
    # wrapper bookkeeping, not kernel compute; plain arrays returned.
    return boxes, scores, labels


# ------------------------------ reference -----------------------------------
def post_process_ref(pred_logits, pred_boxes, positive_map, target_sizes,
                     num_select, chunk_size):
    prob = jax.nn.sigmoid(pred_logits)
    _, idx = lax.top_k(prob.max(-1), num_select)
    prob = jnp.take_along_axis(prob, idx[:, :, None], axis=1)
    bbox = jnp.take_along_axis(pred_boxes, idx[:, :, None], axis=1)
    B, N, T = prob.shape
    scores = np.zeros((B, N, chunk_size), dtype=np.float32)
    prob_np = np.asarray(prob)
    for label_j, toks in positive_map.items():
        scores[:, :, label_j - 1] = prob_np[:, :, np.asarray(toks)].max(-1)
    labels = scores.argmax(-1)
    sc = scores.max(-1)
    tg = np.asarray(target_sizes, dtype=np.float32)[:, ::-1]
    scale = np.tile(tg, (1, 2))[:, None, :]
    boxes = np.asarray(bbox) * scale
    return boxes, np.sqrt(sc), labels + 1


# -------------------------------- main ---------------------------------------
if __name__ == "__main__":
    B, Q, T = 2, 64, 32
    num_select, chunk_size = 16, 8
    positive_map = {1: [0, 1], 2: [3], 5: [4, 5, 6], 7: [10, 12]}

    key = jax.random.PRNGKey(0)
    k1, k2 = jax.random.split(key)
    pred_logits = jax.random.normal(k1, (B, Q, T), dtype=jnp.float32)
    pred_boxes = jax.random.uniform(k2, (B, Q, 4), dtype=jnp.float32)
    target_sizes = jnp.asarray([[480.0, 640.0], [320.0, 480.0]], dtype=jnp.float32)

    boxes, scores, labels = post_process(
        pred_logits, pred_boxes, positive_map, target_sizes,
        num_select=num_select, chunk_size=chunk_size)
    jax.block_until_ready((boxes, scores, labels))

    b_ref, s_ref, l_ref = post_process_ref(
        pred_logits, pred_boxes, positive_map, target_sizes,
        num_select, chunk_size)
    np.testing.assert_allclose(np.asarray(boxes), b_ref, rtol=1e-5, atol=1e-5)
    np.testing.assert_allclose(np.asarray(scores), s_ref, rtol=1e-5, atol=1e-5)
    np.testing.assert_array_equal(np.asarray(labels), l_ref)

    print("KERNEL_OK")
</pallas_src>

<mosaic_0001>
module attributes {stable_mosaic.version = 11 : i64} {
  func.func @_postprocess_kernel(%arg0: i32, %arg1: i32, %arg2: memref<1x32x128xf32, #tpu.memory_space<vmem>>, %arg3: memref<32x1xf32, #tpu.memory_space<vmem>>, %arg4: memref<1x1x128xf32, #tpu.memory_space<vmem>>, %arg5: memref<1x1x128xi32, #tpu.memory_space<vmem>>) attributes {dimension_semantics = [#tpu.dimension_semantics<parallel>, #tpu.dimension_semantics<parallel>], iteration_bounds = array<i64: 2, 1>, scalar_prefetch = 0 : i64, scratch_operands = 0 : i64, tpu.core_type = #tpu.core_type<tc>, window_params = [{transform_indices = @transform_0, window_bounds = array<i64: 1, 32, 128>}, {pipeline_mode = #tpu.pipeline_mode<synchronous>, transform_indices = @transform_1, window_bounds = array<i64: 32, 1>}, {transform_indices = @transform_2, window_bounds = array<i64: 1, 1, 128>}, {transform_indices = @transform_3, window_bounds = array<i64: 1, 1, 128>}]} {
    %c0 = arith.constant 0 : index
    %c0_0 = arith.constant 0 : index
    %c0_1 = arith.constant 0 : index
    %0 = vector.load %arg2[%c0, %c0_0, %c0_1] : memref<1x32x128xf32, #tpu.memory_space<vmem>>, vector<1x32x128xf32>
    %1 = vector.shape_cast %0 : vector<1x32x128xf32> to vector<32x128xf32>
    %c0_2 = arith.constant 0 : index
    %c0_3 = arith.constant 0 : index
    %2 = vector.load %arg3[%c0_2, %c0_3] : memref<32x1xf32, #tpu.memory_space<vmem>>, vector<32x1xf32>
    %3 = vector.shape_cast %2 : vector<32x1xf32> to vector<32x1xf32>
    %4 = vector.broadcast %3 : vector<32x1xf32> to vector<32x128xf32>
    %cst = arith.constant 8.000000e+00 : f32
    %5 = vector.broadcast %cst : f32 to vector<32x128xf32>
    %6 = arith.cmpf olt, %4, %5 : vector<32x128xf32>
    %cst_4 = arith.constant -3.40282347E+38 : f32
    %7 = vector.broadcast %cst_4 : f32 to vector<32x128xf32>
    %8 = arith.select %6, %1, %7 : vector<32x128xi1>, vector<32x128xf32>
    %cst_5 = arith.constant dense<0xFF800000> : vector<128xf32>
    %9 = vector.multi_reduction <maximumf>, %8, %cst_5 [0] : vector<32x128xf32> to vector<128xf32>
    %10 = vector.shape_cast %9 : vector<128xf32> to vector<1x128xf32>
    %11 = vector.broadcast %10 : vector<1x128xf32> to vector<32x128xf32>
    %12 = arith.cmpf oge, %8, %11 : vector<32x128xf32>
    %cst_6 = arith.constant 8.000000e+00 : f32
    %13 = vector.broadcast %cst_6 : f32 to vector<32x128xf32>
    %14 = arith.select %12, %4, %13 : vector<32x128xi1>, vector<32x128xf32>
    %cst_7 = arith.constant dense<0x7F800000> : vector<128xf32>
    %15 = vector.multi_reduction <minimumf>, %14, %cst_7 [0] : vector<32x128xf32> to vector<128xf32>
    %16 = vector.shape_cast %15 : vector<128xf32> to vector<1x128xf32>
    %17 = arith.fptosi %16 : vector<1x128xf32> to vector<1x128xi32>
    %c8_i32 = arith.constant 8 : i32
    %18 = vector.broadcast %c8_i32 : i32 to vector<1x128xi32>
    %19 = arith.cmpi sge, %17, %18 : vector<1x128xi32>
    %c0_i32 = arith.constant 0 : i32
    %20 = vector.broadcast %c0_i32 : i32 to vector<1x128xi32>
    %21 = arith.select %19, %20, %17 : vector<1x128xi1>, vector<1x128xi32>
    %22 = arith.negf %10 : vector<1x128xf32>
    %23 = math.exp %22 : vector<1x128xf32>
    %cst_8 = arith.constant 1.000000e+00 : f32
    %24 = vector.broadcast %cst_8 : f32 to vector<1x128xf32>
    %25 = arith.addf %24, %23 : vector<1x128xf32>
    %26 = arith.divf %24, %25 : vector<1x128xf32>
    %27 = math.sqrt %26 : vector<1x128xf32>
    %c0_9 = arith.constant 0 : index
    %c0_10 = arith.constant 0 : index
    %c0_11 = arith.constant 0 : index
    %28 = vector.load %arg4[%c0_9, %c0_10, %c0_11] : memref<1x1x128xf32, #tpu.memory_space<vmem>>, vector<1x1x128xf32>
    %29 = vector.shape_cast %28 : vector<1x1x128xf32> to vector<1x128xf32>
    %30 = vector.shape_cast %27 : vector<1x128xf32> to vector<1x1x128xf32>
    tpu.vector_store %arg4[%c0_9, %c0_10, %c0_11], %30 {strides = array<i32>} : memref<1x1x128xf32, #tpu.memory_space<vmem>>, vector<1x1x128xf32>,
    %c1_i32 = arith.constant 1 : i32
    %31 = vector.broadcast %c1_i32 : i32 to vector<1x128xi32>
    %32 = arith.addi %21, %31 : vector<1x128xi32>
    %c0_12 = arith.constant 0 : index
    %c0_13 = arith.constant 0 : index
    %c0_14 = arith.constant 0 : index
    %33 = vector.load %arg5[%c0_12, %c0_13, %c0_14] : memref<1x1x128xi32, #tpu.memory_space<vmem>>, vector<1x1x128xi32>
    %34 = vector.shape_cast %33 : vector<1x1x128xi32> to vector<1x128xi32>
    %35 = vector.shape_cast %32 : vector<1x128xi32> to vector<1x1x128xi32>
    tpu.vector_store %arg5[%c0_12, %c0_13, %c0_14], %35 {strides = array<i32>} : memref<1x1x128xi32, #tpu.memory_space<vmem>>, vector<1x1x128xi32>,
    return
  }
  func.func @transform_0(%arg0: i32, %arg1: i32) -> (i32, i32, i32) {
    %c0_i32 = arith.constant 0 : i32
    %c0_i32_0 = arith.constant 0 : i32
    return %arg0, %c0_i32, %arg1 : i32, i32, i32
  }
  func.func @transform_1(%arg0: i32, %arg1: i32) -> (i32, i32) {
    %c0_i32 = arith.constant 0 : i32
    %c0_i32_0 = arith.constant 0 : i32
    %c0_i32_1 = arith.constant 0 : i32
    return %c0_i32, %c0_i32_0 : i32, i32
  }
  func.func @transform_2(%arg0: i32, %arg1: i32) -> (i32, i32, i32) {
    %c0_i32 = arith.constant 0 : i32
    %c0_i32_0 = arith.constant 0 : i32
    return %arg0, %c0_i32, %arg1 : i32, i32, i32
  }
  func.func @transform_3(%arg0: i32, %arg1: i32) -> (i32, i32, i32) {
    %c0_i32 = arith.constant 0 : i32
    %c0_i32_0 = arith.constant 0 : i32
    return %arg0, %c0_i32, %arg1 : i32, i32, i32
  }
}

</mosaic_0001>

<bundles_post_ra>
// kernel: tpu_custom_call.1
= control target key start
LH: loop header
LB: loop body
LE: loop exit
PB: predicated region body
PF: predicated region fallthrough
CT: control target
= control target key end

     0   :  { %9 = vsyncpa [#allocation3], 0  ;;  %s869_s0 = inlined_call_operand.hbm [shape: f32[2,32,128], index: 0, kind: input, shape index: {}]   ;;  %s870_s1 = inlined_call_operand.vmem [shape: f32[32,1], index: 1, kind: input, shape index: {}]   ;;  %s871_s2 = inlined_call_operand.hbm [shape: f32[2,1,128], index: 2, kind: output, shape index: {0}]   ;;  %s872_s3 = inlined_call_operand.hbm [shape: s32[2,1,128], index: 3, kind: output, shape index: {1}]  }
   0x1   :  { %11 = vsyncpa [#allocation3 + $0x1], 0 }
   0x2   :  { %12 = vsyncpa [#allocation4], 0 }
   0x3   :  { %14 = vsyncpa [#allocation4 + $0x1], 0 }
   0x4   :  { %15 = vsyncpa [#allocation7], 0 }
   0x5   :  { %17 = vsyncpa [#allocation7 + $0x1], 0  ;;  %s697_s12 = smov 0   ;;  %s699_s13 = smov 0  }
   0x6   :  { %s701_s14 = smov 0   ;;  %s703_s15 = smov 0  }
   0x7   :  { %s705_s16 = smov 0   ;;  %s707_s17 = smov 0  }
   0x8 LB: > { %s436_s18 = sadd.s32 4294967295, %s669_s17   ;;  %s437_s19 = sadd.s32 4294967294, %s669_s17   ;;  %s669_s17 = sphi %s707_s17, %s23_s17   ;;  %s665_s16 = sphi %s705_s16, %s883_s16   ;;  %s661_s15 = sphi %s703_s15, %s882_s15   ;;  %s657_s14 = sphi %s701_s14, %s881_s14   ;;  %s653_s13 = sphi %s699_s13, %s880_s13   ;;  %s649_s12 = sphi %s697_s12, %s879_s12  }
   0x9   : > { %s35_s20 = sadd.s32 1, %s665_s16  ;;  %s44_s21 = sadd.s32 1, %s657_s14 }
   0xa   : > { %p37_p0 = scmp.ge.s32.totalorder %s35_s20, 2  ;;  %p51_p1 = scmp.ne.s32.totalorder %s657_s14, %s653_s13 }
   0xb   : > { %p52_p2 = scmp.eq.s32.totalorder %s669_s17, 0  ;;  %p57_p3 = scmp.ne.s32.totalorder %s653_s13, %s649_s12 }
   0xc   : > { %s885_s20 = smov (%p37_p0, %s35_s20), 0  ;;  %p58_p5 = scmp.eq.s32.totalorder %s436_s18, 0 }
   0xd   : > { %p738_p4 = por %p52_p2, %p51_p1  ;;  %s39_s23 = ssub.s32 %s665_s16, %s885_s20 }
   0xe   : > { %p104_p6 = scmp.eq.s32.totalorder %s436_s18, 1  ;;  %p42_p7 = scmp.eq.s32.totalorder %s39_s23, 0 }
   0xf   : > { %p744_p8 = por %p58_p5, %p57_p3  ;;  %p110_p10 = scmp.eq.s32.totalorder %s437_s19, 1 }
  0x10   : > { %p748_p9 = por %p104_p6, %p51_p1  ;;  %p470_p13 = scmp.lt.s32.totalorder %s669_s17, 2 }
  0x11   : > { %s753_s26 = scalar_select %p42_p7, %s657_s14, %s44_s21  }
  0x12   : > { %p755_p11 = por %p110_p10, %p57_p3  ;;  %s161_s28 = sand.u32 1, %s657_s14  }
  0x13   : > { %s440_s29 = sshll.u32 %s161_s28, 5  ;;  %s450_s30 = sshll.u32 %s665_s16, 9 }
  0x14   : > { %s172_s6 = scalar_lea.hbm %s869_s0, %s450_s30  ;;  %s165_s7 = scalar_lea.vmem [#allocation2], %s440_s29 }
  0x15   : > { %s173_s8 = sshll.u32 %s165_s7, 4  ;;  %p768_p0 = pnand %p470_p13, %p738_p4  ;;  %s174_s8 = int_to_ptr.vmem [resolvable:$true] %s173_s8 }
  0x16   : > { %p443_p1 = scmp.ge.s32.totalorder %s669_s17, 1  ;;  %s162_s10 = scalar_lea.sflag [#allocation3], %s161_s28 }
  0x17   : > { %p533_p2 = pneg %p768_p0  ;;  %s544_s11 = scalar_lea.vmem %s174_s8, 512 }
  0x18   : > { %p545_p3 = scmp.ne.s32.totalorder %s174_s8, %s544_s11  ;;  %s671_s18 = smov [#allocation2]  }
  0x19   : > { %s549_s19 = sshll.u32 %s671_s18, 4  ;;  %s550_s19 = int_to_ptr.vmem [resolvable:$false] %s549_s19 }
  0x1a   : > { %p547_p5 = pnand %p545_p3, %p533_p2  ;;  %s551_s21 = scalar_lea.vmem %s550_s19, 1024 }
  0x1b   : > { %p552_p7 = scmp.lt.s32.totalorder %s174_s8, %s550_s19  ;;  %p553_p10 = scmp.lt.s32.totalorder %s551_s21, %s544_s11 }
  0x1c   : > { %p548_p6 = pneg %p547_p5 }
  0x1d   : > { %p554_p12 = por %p553_p10, %p552_p7 }
  0x1f   : > { %p555_p4 = pnand %p554_p12, %p548_p6 }
  0x21   : > { %558 = shalt.err (!%p555_p4)
}
  0x22   : > { %s672_s22 = smov 128   ;;  %s673_s23 = smov 8  }
  0x23   : > { %462 = dma.hbm_to_vmem [thread:$0]  (!%p768_p0), %s172_s6, 512, %s174_s8, %s162_s10, %s672_s22, %s672_s22, %s673_s23  }
  0x24   : > { %p181_p13 = scmp.lt.s32.totalorder %s669_s17, 3 }
  0x26   : > { %p182_p2 = pnand %p443_p1, %p181_p13 }
  0x27   : > { %s781_s28 = sand.u32 (!%p182_p2), 1, %s653_s13  }
  0x28   : > { %185 = sbr.rel (%p182_p2) target bundleno = 264 (0x108), region = 28  ;;  %s444_s29 = sshll.u32 (!%p182_p2), %s781_s28, 5 }
  0x29   : > { %s188_s30 = scalar_lea.sflag (!%p182_p2), [#allocation3], %s781_s28  ;;  %s191_s4 = scalar_lea.vmem (!%p182_p2), [#allocation2], %s444_s29 }
  0x2d   : > { %636 = dma.done.wait (%p744_p8), %s188_s30, 512  }
  0x2e   : > { %638 = vsyncadd (%p744_p8), %s188_s30, 4294966784  ;;  %v674_v0 = vmov 0   ;;  %v223_v1 = vld [vmem:[%s870_s1 + $0x10] sm:$0xff]  ;;  %v221_v2 = vld [vmem:[%s870_s1] sm:$0xff]  ;;  %s446_s18 = sshll.u32 %s661_s15, 4  ;;  %s216_s19 = scalar_lea.vmem [#allocation6], %s781_s28 }
  0x2f   : > { %524 = vset.pattern.permute.xlu1 %v674_v0  ;;  %523 = vset.pattern.permute.xlu0 %v674_v0  ;;  %v224_v3 = vld [vmem:[%s870_s1 + $0x18] sm:$0xff]  ;;  %v222_v4 = vld [vmem:[%s870_s1 + $0x8] sm:$0xff]  ;;  %v219_v7 = vld [vmem:[%s191_s4 + $0x10] sm:$0xff]  ;;  %s330_s21 = sshll.u32 %s216_s19, 4  ;;  %s328_s29 = scalar_lea.hbm %s872_s3, %s446_s18  ;;  %s331_s21 = int_to_ptr.vmem [resolvable:$true] %s330_s21 }
  0x30   : > { %237 = vperm.xlu1 %524, %v223_v1   ;;  %227 = vperm.xlu0 %523, %v221_v2   ;;  %v217_v8 = vld [vmem:[%s191_s4] sm:$0xff]  ;;  %v220_v9 = vld [vmem:[%s191_s4 + $0x18] sm:$0xff]  ;;  %v218_v10 = vld [vmem:[%s191_s4 + $0x8] sm:$0xff]  ;;  %s303_s30 = scalar_lea.sflag [#allocation7], %s781_s28  ;;  %s559_s4 = scalar_lea.vmem %s331_s21, 16 }
  0x31   : > { %p560_p8 = scmp.ne.s32.totalorder %s331_s21, %s559_s4  ;;  %s675_s5 = smov [#allocation6]  }
  0x32   : > { %s563_s6 = sshll.u32 %s675_s5, 4  ;;  %s564_s6 = int_to_ptr.vmem [resolvable:$false] %s563_s6 }
  0x33   : > { %p561_p12 = pnand %p560_p8, %p748_p9  ;;  %s565_s7 = scalar_lea.vmem %s564_s6, 32 }
  0x34   : > { %242 = vperm.xlu1 %524, %v224_v3   ;;  %232 = vperm.xlu0 %523, %v222_v4   ;;  %p566_p1 = scmp.lt.s32.totalorder %s331_s21, %s564_s6  ;;  %p567_p3 = scmp.lt.s32.totalorder %s565_s7, %s559_s4 }
  0x35   : > { %p562_p0 = pneg %p561_p12 }
  0x36   : > { %p568_p5 = por %p567_p3, %p566_p1 }
  0x38   : > { %p569_p6 = pnand %p568_p5, %p562_p0 }
  0xab   : > { %v238_v5 = vpop.permute.xlu1 %237  ;;  %v228_v6 = vpop.permute.xlu0 %227 }
  0xac   : > { %vm247_vm0 = vcmp.lt.f32.partialorder %v238_v5, 8.0  ;;  %vm245_vm1 = vcmp.lt.f32.partialorder %v228_v6, 8.0 }
  0xad   : > { %v251_v13 = vsel %vm247_vm0, %v219_v7, -3.4028235e+38  ;;  %v249_v14 = vsel %vm245_vm1, %v217_v8, -3.4028235e+38 }
  0xaf   : > { %v243_v11 = vpop.permute.xlu1 %242  ;;  %v233_v12 = vpop.permute.xlu0 %232 }
  0xb0   : > { %vm248_vm2 = vcmp.lt.f32.partialorder %v243_v11, 8.0  ;;  %vm246_vm3 = vcmp.lt.f32.partialorder %v233_v12, 8.0 }
  0xb1   : > { %v252_v15 = vsel %vm248_vm2, %v220_v9, -3.4028235e+38  ;;  %v250_v16 = vsel %vm246_vm3, %v218_v10, -3.4028235e+38 }
  0xb2   : > { %v254_v17 = vmax.f32 %v251_v13, %v252_v15  ;;  %v253_v18 = vmax.f32 %v249_v14, %v250_v16 }
  0xb4   : > { %v255_v19 = vmax.f32 %v253_v18, %v254_v17 }
  0xb6   : > { %v256_v20 = vrot.slane %v255_v19, 4 }
  0xb8   : > { %v257_v21 = vmax.f32 %v255_v19, %v256_v20 }
  0xba   : > { %v258_v22 = vrot.slane %v257_v21, 2 }
  0xbc   : > { %v259_v23 = vmax.f32 %v257_v21, %v258_v22 }
  0xbe   : > { %v260_v24 = vrot.slane %v259_v23, 1 }
  0xc0   : > { %v261_v25 = vmax.f32 %v259_v23, %v260_v24 }
  0xc2   : > { %vm262_vm4 = vcmp.ge.f32.partialorder %v249_v14, %v261_v25  ;;  %vm263_vm5 = vcmp.ge.f32.partialorder %v250_v16, %v261_v25  ;;  %vm264_vm6 = vcmp.ge.f32.partialorder %v251_v13, %v261_v25  ;;  %vm265_vm7 = vcmp.ge.f32.partialorder %v252_v15, %v261_v25 }
  0xc3   : > { %v266_v26 = vsel %vm262_vm4, %v228_v6, 8.0  ;;  %v267_v27 = vsel %vm263_vm5, %v233_v12, 8.0  ;;  %v268_v28 = vsel %vm264_vm6, %v238_v5, 8.0  ;;  %v269_v29 = vsel %vm265_vm7, %v243_v11, 8.0 }
  0xc4   : > { %v270_v30 = vmin.f32 %v266_v26, %v267_v27  ;;  %v271_v31 = vmin.f32 %v268_v28, %v269_v29  ;;  %v445_v32 = vmul.f32 -1.442695, %v261_v25 }
  0xc6   : > { %v272_v33 = vmin.f32 %v270_v30, %v271_v31  ;;  %525 = vpow2.f32 %v445_v32 }
  0xc8   : > { %v273_v34 = vrot.slane %v272_v33, 4 }
  0xca   : > { %v274_v35 = vmin.f32 %v272_v33, %v273_v34 }
  0xcc   : > { %v275_v36 = vrot.slane %v274_v35, 2 }
  0xce   : > { %v276_v37 = vmin.f32 %v274_v35, %v275_v36 }
  0xd0   : > { %v277_v38 = vrot.slane %v276_v37, 1 }
  0xd2   : > { %v278_v39 = vmin.f32 %v276_v37, %v277_v38 }
  0xd3   : > { %v526_v40 = vpop.eup %525 }
  0xd4   : > { %v451_v41 = vtrunc.f32 %v278_v39  ;;  %v285_v42 = vadd.f32 1.0, %v526_v40 }
  0xd6   : > { %v452_v43 = vcvt.f32.s32 %v451_v41  ;;  %527 = vrcp.f32 %v285_v42 }
  0xd8   : > { %vm280_vm8 = vcmp.ge.s32.totalorder %v452_v43, 8 }
  0xd9   : > { %v281_v44 = vsel %vm280_vm8, 0, %v452_v43 }
  0xda   : > { %v296_v45 = vadd.s32 1, %v281_v44 }
  0xdc   : > { %297 = vst [vmem:[%s216_s19] sm:$0x1] %v296_v45 }
  0xdd   : > { %572 = shalt.err (!%p569_p6)
}
  0xde   : > { %s573_s8 = scalar_lea.hbm %s328_s29, 16  ;;  %s577_s11 = scalar_lea.hbm %s872_s3, 32 }
  0xdf   : > { %p574_p7 = scmp.ne.s32.totalorder %s328_s29, %s573_s8  ;;  %p578_p13 = scmp.lt.s32.totalorder %s328_s29, %s872_s3 }
  0xe0   : > { %p579_p2 = scmp.lt.s32.totalorder %s577_s11, %s573_s8 }
  0xe1   : > { %p575_p10 = pnand %p574_p7, %p748_p9 }
  0xe2   : > { %p580_p8 = por %p579_p2, %p578_p13 }
  0xe3   : > { %p576_p4 = pneg %p575_p10 }
  0xe5   : > { %p581_p12 = pnand %p580_p8, %p576_p4 }
  0xe7   : > { %584 = shalt.err (!%p581_p12)
}
  0xe8   : > { %456 = dma.vmem_to_hbm [thread:$0]  (%p748_p9), %s331_s21, 16, %s328_s29, %s303_s30   ;;  %v528_v46 = vpop.eup %527 }
  0xe9   : > { %529 = vrsqrt.f32 %v528_v46  ;;  %s210_s22 = scalar_lea.vmem [#allocation5], %s781_s28  ;;  %vm290_vm9 = vcmp.eq.f32.partialorder %v528_v46, inf  ;;  %v293_v49 = vand.u32 2147483648, %v528_v46  ;;  %vm292_vm10 = vcmp.eq.f32.partialorder %v528_v46, 0.0  ;;  %s827_s6 = scalar_lea.hbm %s871_s2, %s446_s18 }
  0xea   : > { %s316_s23 = sshll.u32 %s210_s22, 4  ;;  %s299_s21 = scalar_lea.sflag [#allocation4], %s781_s28  ;;  %s317_s23 = int_to_ptr.vmem [resolvable:$true] %s316_s23 }
  0xeb   : > { %s585_s29 = scalar_lea.vmem %s317_s23, 16  ;;  %s676_s30 = smov [#allocation5]  }
  0xec   : > { %p586_p0 = scmp.ne.s32.totalorder %s317_s23, %s585_s29  ;;  %s589_s7 = sshll.u32 %s676_s30, 4  ;;  %s590_s7 = int_to_ptr.vmem [resolvable:$false] %s589_s7 }
  0xed   : > { %s591_s8 = scalar_lea.vmem %s590_s7, 32  ;;  %p592_p5 = scmp.lt.s32.totalorder %s317_s23, %s590_s7 }
  0xee   : > { %p587_p1 = pnand %p586_p0, %p748_p9  ;;  %p593_p6 = scmp.lt.s32.totalorder %s591_s8, %s585_s29 }
  0xf0   : > { %p588_p3 = pneg %p587_p1  ;;  %p594_p7 = por %p593_p6, %p592_p5 }
  0xf2   : > { %p595_p10 = pnand %p594_p7, %p588_p3 }
  0xf6   : > { %v530_v47 = vpop.eup %529 }
  0xf7   : > { %v289_v48 = vmul.f32 %v530_v47, %v528_v46 }
  0xf9   : > { %v291_v50 = vsel %vm290_vm9, %v528_v46, %v289_v48 }
  0xfa   : > { %v294_v51 = vsel %vm292_vm10, %v293_v49, %v291_v50 }
  0xfb   : > { %295 = vst [vmem:[%s210_s22] sm:$0x1] %v294_v51 }
  0xfc   : > { %598 = shalt.err (!%p595_p10)
}
  0xfd   : > { %s599_s15 = scalar_lea.hbm %s827_s6, 16  ;;  %s603_s9 = scalar_lea.hbm %s871_s2, 32 }
  0xfe   : > { %p600_p4 = scmp.ne.s32.totalorder %s827_s6, %s599_s15  ;;  %p604_p8 = scmp.lt.s32.totalorder %s827_s6, %s871_s2 }
  0xff   : > { %p605_p12 = scmp.lt.s32.totalorder %s603_s9, %s599_s15 }
 0x100   : > { %p601_p13 = pnand %p600_p4, %p748_p9 }
 0x101   : > { %p606_p0 = por %p605_p12, %p604_p8 }
 0x102   : > { %p602_p2 = pneg %p601_p13 }
 0x104   : > { %p607_p1 = pnand %p606_p0, %p602_p2 }
 0x106   : > { %610 = shalt.err (!%p607_p1)
}
 0x107   : > { %455 = dma.vmem_to_hbm [thread:$0]  (%p748_p9), %s317_s23, 16, %s827_s6, %s299_s21  }
 0x108 PF: > { %s342_s24 = sand.u32 1, %s649_s12   ;;  %p878_p3 = scmp.ge.s32.totalorder %s669_s17, 2 }
 0x109   : > { %s343_s19 = scalar_lea.sflag [#allocation4], %s342_s24 }
 0x10a   : > { %p464_p5 = pnand %p878_p3, %p755_p11 }
 0x10c   : > { %p465_p6 = pneg %p464_p5 }
 0x10e   : > { %640 = dma.done.wait (%p465_p6), %s343_s19, 16  }
 0x10f   : > { %642 = vsyncadd (%p465_p6), %s343_s19, 4294967280  ;;  %s351_s22 = scalar_lea.sflag [#allocation7], %s342_s24 }
 0x110   : > { %644 = dma.done.wait (%p465_p6), %s351_s22, 16  }
 0x111   : > { %646 = vsyncadd (%p465_p6), %s351_s22, 4294967280  ;;  %s23_s17 = sadd.s32 1, %s669_s17   ;;  %s879_s12 = smov %s653_s13 }
 0x112   : > { %p20_p7 = scmp.ge.s32.totalorder %s23_s17, 4   ;;  %s880_s13 = smov %s657_s14 }
 0x113   : > { %s881_s14 = smov %s753_s26  ;;  %s882_s15 = smov %s665_s16 }
 0x114   : > { %s883_s16 = smov %s885_s20  ;;  %22 = sbr.rel (!%p20_p7) target bundleno = 8 (0x8), region = 90 }
 0x119   :  { %355 = vsyncpa [#allocation3], 1 }
 0x11a   :  { %357 = vsyncpa [#allocation3 + $0x1], 1 }
 0x11b   :  { %358 = vsyncpa [#allocation4], 1 }
 0x11c   :  { %360 = vsyncpa [#allocation4 + $0x1], 1 }
 0x11d   :  { %361 = vsyncpa [#allocation7], 1 }
 0x11e   :  { %363 = vsyncpa [#allocation7 + $0x1], 1 }

</bundles_post_ra>
